<compile_context>
chip_gen: v7x
topology: tpu7x:2x2x1
jax: 0.10.0
libtpu: 0.0.40
codegen_flags: <defaults>
</compile_context>

<pallas_src>
import math

import jax
import jax.numpy as jnp
from jax.experimental import pallas as pl
from jax.experimental.pallas import tpu as pltpu

LANE = 128


def _round_up(n, m):
    return ((n + m - 1) // m) * m


# ---------------------------------------------------------------------------
# Kernels
# ---------------------------------------------------------------------------
def _gcn_layer_kernel(a_ref, x_ref, w_ref, b_ref, o_ref, acc_ref):
    """GCN layer:  o = relu((A @ x) @ W + b), accumulated over the k (A-column) axis."""
    k = pl.program_id(1)

    @pl.when(k == 0)
    def _():
        acc_ref[...] = jnp.zeros_like(acc_ref)

    # bf16 x bf16 -> f32 accumulate on the MXU.
    acc_ref[...] += jnp.dot(a_ref[...], x_ref[...],
                            preferred_element_type=jnp.float32)

    @pl.when(k == pl.num_programs(1) - 1)
    def _():
        h = jnp.dot(acc_ref[...].astype(jnp.bfloat16), w_ref[...],
                    preferred_element_type=jnp.float32) + b_ref[...]
        o_ref[...] = jnp.maximum(h, 0.0).astype(o_ref.dtype)


def _gcn_layer_final_kernel(a_ref, x_ref, w_ref, b_ref, w3_ref, b3_ref,
                            o_ref, acc_ref):
    """GCN layer 2 + ReLU + Dropout(identity at inference) + final Linear, fused."""
    k = pl.program_id(1)

    @pl.when(k == 0)
    def _():
        acc_ref[...] = jnp.zeros_like(acc_ref)

    acc_ref[...] += jnp.dot(a_ref[...], x_ref[...],
                            preferred_element_type=jnp.float32)

    @pl.when(k == pl.num_programs(1) - 1)
    def _():
        h = jnp.dot(acc_ref[...].astype(jnp.bfloat16), w_ref[...],
                    preferred_element_type=jnp.float32) + b_ref[...]
        h = jnp.maximum(h, 0.0)
        # Dropout(p=0.2) is the identity at inference time.
        o_ref[...] = (jnp.dot(h.astype(jnp.bfloat16), w3_ref[...],
                              preferred_element_type=jnp.float32)
                      + b3_ref[...]).astype(o_ref.dtype)


# ---------------------------------------------------------------------------
# pallas_call wrapper for one (fused) GCN layer
# ---------------------------------------------------------------------------
def _gcn_layer_call(kernel, adj, x, weights, biases, out_cols, out_dtype, tm, tk):
    n_pad = adj.shape[0]
    cin = x.shape[1]
    grid = (n_pad // tm, n_pad // tk)

    in_specs = [
        pl.BlockSpec((tm, tk), lambda i, k: (i, k)),    # A row/col tile
        pl.BlockSpec((tk, cin), lambda i, k: (k, 0)),   # X k-panel (lane-dense)
    ]
    args = [adj, x]
    for w, b in zip(weights, biases):
        in_specs.append(pl.BlockSpec(w.shape, lambda i, k: (0, 0)))
        in_specs.append(pl.BlockSpec(b.shape, lambda i, k: (0, 0)))
        args.extend([w, b])

    return pl.pallas_call(
        kernel,
        out_shape=jax.ShapeDtypeStruct((n_pad, out_cols), out_dtype),
        grid=grid,
        in_specs=in_specs,
        out_specs=pl.BlockSpec((tm, out_cols), lambda i, k: (i, 0)),
        scratch_shapes=[pltpu.VMEM((tm, cin), jnp.float32)],
        compiler_params=pltpu.CompilerParams(
            dimension_semantics=("parallel", "arbitrary")),
    )(*args)


# ---------------------------------------------------------------------------
# One-time parameter preprocessing (transpose + lane pad + bf16 cast).
# ---------------------------------------------------------------------------
def prepare_params(params, in_channels, hidden_channels, out_channels):
    cin_p = _round_up(in_channels, LANE)
    h_p = _round_up(hidden_channels, LANE)
    co_p = _round_up(out_channels, LANE)

    def pad2(a, r, c):
        return jnp.zeros((r, c), a.dtype).at[:a.shape[0], :a.shape[1]].set(a)

    return {
        # nn.Linear: y = x @ W.T + b -> store W already as (in, out), padded, bf16.
        "w1": pad2(params["w1"].T, cin_p, h_p).astype(jnp.bfloat16),
        "w2": pad2(params["w2"].T, h_p, h_p).astype(jnp.bfloat16),
        "w3": pad2(params["w3"].T, h_p, co_p).astype(jnp.bfloat16),
        # Biases stay f32 (epilogue math kept f32 for v5e VPU).
        "b1": pad2(params["b1"].reshape(1, -1), 1, h_p).astype(jnp.float32),
        "b2": pad2(params["b2"].reshape(1, -1), 1, h_p).astype(jnp.float32),
        "b3": pad2(params["b3"].reshape(1, -1), 1, co_p).astype(jnp.float32),
        "cin_p": cin_p, "h_p": h_p, "co_p": co_p,
        "in_channels": in_channels, "out_channels": out_channels,
    }


# ---------------------------------------------------------------------------
# Forward pass
# ---------------------------------------------------------------------------
def simple_gnn_forward(x, edge_index, prep, *, tm=256, tk=256):
    """x: (N, in_channels) f32, edge_index: (2, E) int32 (row=dst, col=src)."""
    n = x.shape[0]
    row, col = edge_index[0], edge_index[1]

    # Normalized adjacency, exactly matching ManualGCNLayer:
    # deg = bincount(row); norm = deg^-1/2[row] * deg^-1/2[col]; A[row, col] += norm.
    deg = jnp.bincount(row, length=n).astype(jnp.float32)
    deg_inv_sqrt = jnp.where(deg > 0.0, jax.lax.rsqrt(deg), 0.0)
    norm = deg_inv_sqrt[row] * deg_inv_sqrt[col]

    # Zero-pad N to a multiple of both tile sizes; padded rows/cols of A are 0,
    # so they never contaminate real rows and are sliced off at the end.
    n_pad = _round_up(n, math.lcm(tm, tk))
    adj = (jnp.zeros((n_pad, n_pad), jnp.float32)
           .at[row, col].add(norm)
           .astype(jnp.bfloat16))

    x_pad = (jnp.zeros((n_pad, prep["cin_p"]), jnp.bfloat16)
             .at[:n, :x.shape[1]].set(x.astype(jnp.bfloat16)))

    # Layer 1: h1 = relu((A @ x) @ W1 + b1)   -> bf16 (feeds next layer's MXU).
    h1 = _gcn_layer_call(_gcn_layer_kernel, adj, x_pad,
                         (prep["w1"],), (prep["b1"],),
                         out_cols=prep["h_p"], out_dtype=jnp.bfloat16,
                         tm=tm, tk=tk)

    # Layer 2 + ReLU + Dropout(identity) + final Linear, fused.
    out_pad = _gcn_layer_call(_gcn_layer_final_kernel, adj, h1,
                              (prep["w2"], prep["w3"]),
                              (prep["b2"], prep["b3"]),
                              out_cols=prep["co_p"], out_dtype=jnp.float32,
                              tm=tm, tk=tk)

    return out_pad[:n, :prep["out_channels"]]


# ---------------------------------------------------------------------------
# Deterministic parameter init (shapes match SimpleGNN.__init__, PyTorch convention).
# ---------------------------------------------------------------------------
def init_params(key, in_channels, hidden_channels, out_channels):
    ks = jax.random.split(key, 6)
    scale = 0.1
    return {
        "w1": scale * jax.random.normal(ks[0], (hidden_channels, in_channels), jnp.float32),
        "b1": scale * jax.random.normal(ks[1], (hidden_channels,), jnp.float32),
        "w2": scale * jax.random.normal(ks[2], (hidden_channels, hidden_channels), jnp.float32),
        "b2": scale * jax.random.normal(ks[3], (hidden_channels,), jnp.float32),
        "w3": scale * jax.random.normal(ks[4], (out_channels, hidden_channels), jnp.float32),
        "b3": scale * jax.random.normal(ks[5], (out_channels,), jnp.float32),
    }


if __name__ == "__main__":
    N = 16               # nodes
    IN_CH = 8            # in_channels
    HIDDEN = 32          # hidden_channels
    OUT_CH = 1           # out_channels (scalar polymer-property prediction)

    key = jax.random.PRNGKey(0)
    kx, kp = jax.random.split(key, 2)

    # Node features.
    x = jax.random.normal(kx, (N, IN_CH), jnp.float32)

    # Deterministic small graph: bidirectional ring + a few chords.
    src = list(range(N)) + list(range(N)) + [0, 3, 7, 11]
    dst = [(i + 1) % N for i in range(N)] + [(i - 1) % N for i in range(N)] + [8, 12, 2, 5]
    edge_index = jnp.array([dst, src], dtype=jnp.int32)   # (2, E): (row, col)

    params = init_params(kp, IN_CH, HIDDEN, OUT_CH)
    prep = prepare_params(params, IN_CH, HIDDEN, OUT_CH)   # one-time transpose/pad/cast

    out = simple_gnn_forward(x, edge_index, prep)
    jax.block_until_ready(out)
    assert out.shape == (N, OUT_CH), out.shape
    print("KERNEL_OK")
</pallas_src>

<mosaic_0001>
module attributes {stable_mosaic.version = 11 : i64} {
  func.func @_gcn_layer_kernel(%arg0: i32, %arg1: i32, %arg2: memref<256x256xbf16, #tpu.memory_space<vmem>>, %arg3: memref<256x128xbf16, #tpu.memory_space<vmem>>, %arg4: memref<128x128xbf16, #tpu.memory_space<vmem>>, %arg5: memref<1x128xf32, #tpu.memory_space<vmem>>, %arg6: memref<256x128xbf16, #tpu.memory_space<vmem>>, %arg7: memref<256x128xf32, #tpu.memory_space<vmem>>) attributes {dimension_semantics = [#tpu.dimension_semantics<parallel>, #tpu.dimension_semantics<arbitrary>], iteration_bounds = array<i64: 1, 1>, scalar_prefetch = 0 : i64, scratch_operands = 1 : i64, tpu.core_type = #tpu.core_type<tc>, window_params = [{transform_indices = @transform_0, window_bounds = array<i64: 256, 256>}, {transform_indices = @transform_1, window_bounds = array<i64: 256, 128>}, {pipeline_mode = #tpu.pipeline_mode<synchronous>, transform_indices = @transform_2, window_bounds = array<i64: 128, 128>}, {pipeline_mode = #tpu.pipeline_mode<synchronous>, transform_indices = @transform_3, window_bounds = array<i64: 1, 128>}, {transform_indices = @transform_4, window_bounds = array<i64: 256, 128>}]} {
    %c0_i32 = arith.constant 0 : i32
    %0 = arith.cmpi eq, %arg1, %c0_i32 : i32
    %1 = arith.extui %0 : i1 to i32
    %c0_i32_0 = arith.constant 0 : i32
    %2 = arith.cmpi ne, %1, %c0_i32_0 : i32
    scf.if %2 {
      %cst_10 = arith.constant 0.000000e+00 : f32
      %12 = vector.broadcast %cst_10 : f32 to vector<256x128xf32>
      %c0_11 = arith.constant 0 : index
      %c0_12 = arith.constant 0 : index
      %13 = vector.load %arg7[%c0_11, %c0_12] : memref<256x128xf32, #tpu.memory_space<vmem>>, vector<256x128xf32>
      tpu.vector_store %arg7[%c0_11, %c0_12], %12 {strides = array<i32>} : memref<256x128xf32, #tpu.memory_space<vmem>>, vector<256x128xf32>,
    } else {
    }
    %c0 = arith.constant 0 : index
    %c0_1 = arith.constant 0 : index
    %3 = vector.load %arg7[%c0, %c0_1] : memref<256x128xf32, #tpu.memory_space<vmem>>, vector<256x128xf32>
    %c0_2 = arith.constant 0 : index
    %c0_3 = arith.constant 0 : index
    %4 = vector.load %arg2[%c0_2, %c0_3] : memref<256x256xbf16, #tpu.memory_space<vmem>>, vector<256x256xbf16>
    %c0_4 = arith.constant 0 : index
    %c0_5 = arith.constant 0 : index
    %5 = vector.load %arg3[%c0_4, %c0_5] : memref<256x128xbf16, #tpu.memory_space<vmem>>, vector<256x128xbf16>
    %cst = arith.constant dense<0.000000e+00> : vector<256x128xf32>
    %6 = tpu.matmul %4, %5, %cst {dimension_numbers = #tpu.dot_dimension_numbers<[1], [0], [0], [1], [0, 0, 1, 1], [], []>} : vector<256x256xbf16>, vector<256x128xbf16>, vector<256x128xf32> -> vector<256x128xf32>
    %7 = arith.addf %3, %6 : vector<256x128xf32>
    %c0_6 = arith.constant 0 : index
    %c0_7 = arith.constant 0 : index
    %8 = vector.load %arg7[%c0_6, %c0_7] : memref<256x128xf32, #tpu.memory_space<vmem>>, vector<256x128xf32>
    tpu.vector_store %arg7[%c0_6, %c0_7], %7 {strides = array<i32>} : memref<256x128xf32, #tpu.memory_space<vmem>>, vector<256x128xf32>,
    %c0_i32_8 = arith.constant 0 : i32
    %9 = arith.cmpi eq, %arg1, %c0_i32_8 : i32
    %10 = arith.extui %9 : i1 to i32
    %c0_i32_9 = arith.constant 0 : i32
    %11 = arith.cmpi ne, %10, %c0_i32_9 : i32
    scf.if %11 {
      %c0_10 = arith.constant 0 : index
      %c0_11 = arith.constant 0 : index
      %12 = vector.load %arg7[%c0_10, %c0_11] : memref<256x128xf32, #tpu.memory_space<vmem>>, vector<256x128xf32>
      %13 = arith.truncf %12 : vector<256x128xf32> to vector<256x128xbf16>
      %c0_12 = arith.constant 0 : index
      %c0_13 = arith.constant 0 : index
      %14 = vector.load %arg4[%c0_12, %c0_13] : memref<128x128xbf16, #tpu.memory_space<vmem>>, vector<128x128xbf16>
      %cst_14 = arith.constant dense<0.000000e+00> : vector<256x128xf32>
      %15 = tpu.matmul %13, %14, %cst_14 {dimension_numbers = #tpu.dot_dimension_numbers<[1], [0], [0], [1], [0, 0, 1, 1], [], []>} : vector<256x128xbf16>, vector<128x128xbf16>, vector<256x128xf32> -> vector<256x128xf32>
      %c0_15 = arith.constant 0 : index
      %c0_16 = arith.constant 0 : index
      %16 = vector.load %arg5[%c0_15, %c0_16] : memref<1x128xf32, #tpu.memory_space<vmem>>, vector<1x128xf32>
      %17 = vector.broadcast %16 : vector<1x128xf32> to vector<256x128xf32>
      %18 = arith.addf %15, %17 : vector<256x128xf32>
      %cst_17 = arith.constant 0.000000e+00 : f32
      %19 = vector.broadcast %cst_17 : f32 to vector<256x128xf32>
      %20 = arith.maximumf %18, %19 : vector<256x128xf32>
      %21 = arith.truncf %20 : vector<256x128xf32> to vector<256x128xbf16>
      %c0_18 = arith.constant 0 : index
      %c0_19 = arith.constant 0 : index
      %22 = vector.load %arg6[%c0_18, %c0_19] : memref<256x128xbf16, #tpu.memory_space<vmem>>, vector<256x128xbf16>
      tpu.vector_store %arg6[%c0_18, %c0_19], %21 {strides = array<i32>} : memref<256x128xbf16, #tpu.memory_space<vmem>>, vector<256x128xbf16>,
    } else {
    }
    return
  }
  func.func @transform_0(%arg0: i32, %arg1: i32) -> (i32, i32) {
    %c0_i32 = arith.constant 0 : i32
    return %arg0, %arg1 : i32, i32
  }
  func.func @transform_1(%arg0: i32, %arg1: i32) -> (i32, i32) {
    %c0_i32 = arith.constant 0 : i32
    %c0_i32_0 = arith.constant 0 : i32
    return %arg1, %c0_i32 : i32, i32
  }
  func.func @transform_2(%arg0: i32, %arg1: i32) -> (i32, i32) {
    %c0_i32 = arith.constant 0 : i32
    %c0_i32_0 = arith.constant 0 : i32
    %c0_i32_1 = arith.constant 0 : i32
    return %c0_i32, %c0_i32_0 : i32, i32
  }
  func.func @transform_3(%arg0: i32, %arg1: i32) -> (i32, i32) {
    %c0_i32 = arith.constant 0 : i32
    %c0_i32_0 = arith.constant 0 : i32
    %c0_i32_1 = arith.constant 0 : i32
    return %c0_i32, %c0_i32_0 : i32, i32
  }
  func.func @transform_4(%arg0: i32, %arg1: i32) -> (i32, i32) {
    %c0_i32 = arith.constant 0 : i32
    %c0_i32_0 = arith.constant 0 : i32
    return %arg0, %c0_i32 : i32, i32
  }
}

</mosaic_0001>

<bundles_post_ra>
// kernel: tpu_custom_call.1
= control target key start
LH: loop header
LB: loop body
LE: loop exit
PB: predicated region body
PF: predicated region fallthrough
CT: control target
= control target key end

     0   :  { %9 = vsyncpa [#allocation4], 0  ;;  %s1919_s0 = inlined_call_operand.hbm [shape: bf16[256,256], index: 0, kind: input, shape index: {}]   ;;  %s1920_s1 = inlined_call_operand.hbm [shape: bf16[256,128], index: 1, kind: input, shape index: {}]   ;;  %s1921_s2 = inlined_call_operand.hbm [shape: bf16[128,128], index: 2, kind: input, shape index: {}]   ;;  %s1922_s3 = inlined_call_operand.vmem [shape: f32[1,128], index: 3, kind: input, shape index: {}]   ;;  %s1923_s4 = inlined_call_operand.hbm [shape: bf16[256,128], index: 4, kind: output, shape index: {}]  }
   0x1   :  { %10 = vsyncpa [#allocation7], 0 }
   0x2   :  { %11 = vsyncpa [#allocation5], 0  ;;  %s1756_s15 = smov [#allocation6]   ;;  %s1662_s19 = scalar_lea.hbm %s1920_s1, 2048 }
   0x3   :  { %s29_s16 = sshll.u32 %s1756_s15, 4  ;;  %p1663_p0 = scmp.ne.s32.totalorder %s1920_s1, %s1662_s19  ;;  %s30_s16 = int_to_ptr.vmem [resolvable:$true] %s29_s16 }
   0x4   :  { %p1666_p1 = scmp.lt.u32.totalorder %s1662_s19, %s1920_s1 }
   0x6   :  { %p1668_p2 = pnand %p1666_p1, %p1663_p0 }
   0x8   :  { %1671 = shalt.err (!%p1668_p2)
}
   0x9   :  { %s1672_s24 = scalar_lea.vmem %s30_s16, 2048  ;;  %p1677_p4 = scmp.lt.s32.totalorder %s30_s16, %s30_s16 }
   0xa   :  { %p1673_p3 = scmp.ne.s32.totalorder %s30_s16, %s1672_s24  ;;  %p1678_p5 = scmp.lt.s32.totalorder %s1672_s24, %s1672_s24 }
   0xc   :  { %p1679_p6 = por %p1678_p5, %p1677_p4 }
   0xe   :  { %p1680_p7 = pnand %p1679_p6, %p1673_p3 }
  0x10   :  { %1683 = shalt.err (!%p1680_p7)
}
  0x11   :  { %s1757_s25 = smov 64   ;;  %s1758_s26 = smov 4  }
  0x12   :  { %35 = dma.hbm_to_vmem [thread:$0]  %s1920_s1, 2048, %s30_s16, [#allocation7], %s1757_s25, %s1757_s25, %s1758_s26  }
  0x13   :  { %s1759_s29 = smov [#allocation3]   ;;  %s1684_s7 = scalar_lea.hbm %s1919_s0, 4096 }
  0x14   :  { %s17_s30 = sshll.u32 %s1759_s29, 4  ;;  %p1685_p8 = scmp.ne.s32.totalorder %s1919_s0, %s1684_s7  ;;  %s18_s30 = int_to_ptr.vmem [resolvable:$true] %s17_s30 }
  0x15   :  { %p1688_p9 = scmp.lt.u32.totalorder %s1684_s7, %s1919_s0 }
  0x17   :  { %p1690_p10 = pnand %p1688_p9, %p1685_p8 }
  0x19   :  { %1693 = shalt.err (!%p1690_p10)
}
  0x1a   :  { %s1694_s12 = scalar_lea.vmem %s18_s30, 4096  ;;  %p1699_p12 = scmp.lt.s32.totalorder %s18_s30, %s18_s30 }
  0x1b   :  { %p1695_p11 = scmp.ne.s32.totalorder %s18_s30, %s1694_s12  ;;  %p1700_p13 = scmp.lt.s32.totalorder %s1694_s12, %s1694_s12 }
  0x1d   :  { %p1701_p0 = por %p1700_p13, %p1699_p12 }
  0x1f   :  { %p1702_p1 = pnand %p1701_p0, %p1695_p11 }
  0x21   :  { %1705 = shalt.err (!%p1702_p1)
}
  0x22   :  { %s1760_s1 = smov 128   ;;  %s1761_s13 = smov 8  }
  0x23   :  { %23 = dma.hbm_to_vmem [thread:$0]  %s1919_s0, 4096, %s18_s30, [#allocation4], %s1760_s1, %s1760_s1, %s1761_s13  }
  0x24   :  { %s1762_s16 = smov [#allocation8]   ;;  %s1706_s20 = scalar_lea.hbm %s1921_s2, 1024 }
  0x25   :  { %s41_s17 = sshll.u32 %s1762_s16, 4  ;;  %p1707_p2 = scmp.ne.s32.totalorder %s1921_s2, %s1706_s20  ;;  %s42_s17 = int_to_ptr.vmem [resolvable:$true] %s41_s17 }
  0x26   :  { %p1710_p3 = scmp.lt.u32.totalorder %s1706_s20, %s1921_s2 }
  0x28   :  { %p1712_p4 = pnand %p1710_p3, %p1707_p2 }
  0x2a   :  { %1715 = shalt.err (!%p1712_p4)
}
  0x2b   :  { %s1716_s27 = scalar_lea.vmem %s42_s17, 1024  ;;  %p1721_p6 = scmp.lt.s32.totalorder %s42_s17, %s42_s17 }
  0x2c   :  { %p1717_p5 = scmp.ne.s32.totalorder %s42_s17, %s1716_s27  ;;  %p1722_p7 = scmp.lt.s32.totalorder %s1716_s27, %s1716_s27 }
  0x2e   :  { %p1723_p8 = por %p1722_p7, %p1721_p6 }
  0x30   :  { %p1724_p9 = pnand %p1723_p8, %p1717_p5 }
  0x32   :  { %1727 = shalt.err (!%p1724_p9)
}
  0x33   :  { %47 = dma.hbm_to_vmem [thread:$0]  %s1921_s2, 1024, %s42_s17, [#allocation7], %s1757_s25, %s1757_s25, %s1758_s26  }
  0x34   :  { %1750 = dma.done.wait [#allocation4], 4096  }
  0x35   :  { %1751 = vsyncadd [#allocation4], 4294963200 }
  0x36   :  { %1752 = dma.done.wait [#allocation7], 3072  }
  0x37   :  { %1753 = vsyncadd [#allocation7], 4294964224  ;;  %v1590_v0 = vld [vmem:[#allocation6 + $0x40] sm:$0xff]   ;;  %v1592_v2 = vld [vmem:[#allocation6 + $0x48] sm:$0xff]  }
  0x38   :  { %v1591_v1 = vld [vmem:[#allocation6] sm:$0xff]   ;;  %1382 = vmatprep.subr.bf16.mxu0 %v1590_v0  ;;  %1566 = vmatprep.subr.bf16.mxu1 %v1590_v0  ;;  %v1593_v3 = vld [vmem:[#allocation6 + $0x8] sm:$0xff]   ;;  %v1594_v4 = vld [vmem:[#allocation6 + $0x50] sm:$0xff]  }
  0x39   :  { %1383 = vmatpush3.bf16.msra.mxu0 %v1591_v1  ;;  %1574 = vmatpush3.bf16.msra.mxu1 %v1591_v1  ;;  %v1595_v5 = vld [vmem:[#allocation6 + $0x10] sm:$0xff]   ;;  %v1596_v6 = vld [vmem:[#allocation6 + $0x58] sm:$0xff]   ;;  %v1598_v8 = vld [vmem:[#allocation6 + $0x60] sm:$0xff]  }
  0x3a   :  { %1384 = vmatprep.subr.bf16.mxu0 %v1592_v2  ;;  %1567 = vmatprep.subr.bf16.mxu1 %v1592_v2  ;;  %v1597_v7 = vld [vmem:[#allocation6 + $0x18] sm:$0xff]   ;;  %v1599_v9 = vld [vmem:[#allocation6 + $0x20] sm:$0xff]   ;;  %v1600_v10 = vld [vmem:[#allocation6 + $0x68] sm:$0xff]  }
  0x3b   :  { %v1608_v11 = vld [vmem:[#allocation3 + $0x4] ss:$8 sps:$4 sm:$0xff]   ;;  %v1602_v13 = vld [vmem:[#allocation6 + $0x70] sm:$0xff]   ;;  %v1604_v15 = vld [vmem:[#allocation6 + $0x78] sm:$0xff]  }
  0x3c   :  { %v1601_v12 = vld [vmem:[#allocation6 + $0x28] sm:$0xff]   ;;  %480 = vmatprep.mubr.bf16.mxu0 %v1608_v11  ;;  %v1603_v14 = vld [vmem:[#allocation6 + $0x30] sm:$0xff]   ;;  %v1605_v16 = vld [vmem:[#allocation6 + $0x38] sm:$0xff]  }
  0x3d   :  { %1385 = vmatpush3.bf16.msra.mxu0 %v1593_v3  ;;  %1575 = vmatpush3.bf16.msra.mxu1 %v1593_v3  ;;  %v1606_v17 = vld [vmem:[#allocation3] ss:$8 sps:$4 sm:$0xff]   ;;  %v1638_v18 = vld [vmem:[#allocation3 + $0xc4] ss:$8 sps:$4 sm:$0xff]   ;;  %v1609_v19 = vld [vmem:[#allocation3 + $0x14] ss:$8 sps:$4 sm:$0xff]  }
  0x3e   :  { %1386 = vmatprep.subr.bf16.mxu0 %v1594_v4  ;;  %1568 = vmatprep.subr.bf16.mxu1 %v1594_v4  ;;  %v1636_v20 = vld [vmem:[#allocation3 + $0xc0] ss:$8 sps:$4 sm:$0xff]   ;;  %v1642_v21 = vld [vmem:[#allocation3 + $0xd4] ss:$8 sps:$4 sm:$0xff]   ;;  %v1611_v22 = vld [vmem:[#allocation3 + $0x10] ss:$8 sps:$4 sm:$0xff]  }
  0x3f   :  { %576 = vmatprep.mubr.bf16.mxu1 %v1638_v18  ;;  %v1612_v23 = vld [vmem:[#allocation3 + $0x24] ss:$8 sps:$4 sm:$0xff]   ;;  %v1644_v24 = vld [vmem:[#allocation3 + $0xd0] ss:$8 sps:$4 sm:$0xff]   ;;  %v1614_v29 = vld [vmem:[#allocation3 + $0x20] ss:$8 sps:$4 sm:$0xff]  }
  0x40   :  { %v1654_v25 = vld [vmem:[#allocation8] sm:$0xff]   ;;  %v1655_v26 = vld [vmem:[#allocation8 + $0x8] sm:$0xff]   ;;  %v1656_v28 = vld [vmem:[#allocation8 + $0x10] sm:$0xff]  }
  0x41   :  { %1387 = vmatpush3.bf16.msra.mxu0 %v1595_v5  ;;  %1576 = vmatpush3.bf16.msra.mxu1 %v1595_v5  ;;  %v1648_v27 = vld [vmem:[#allocation3 + $0xe4] ss:$8 sps:$4 sm:$0xff]   ;;  %v1657_v30 = vld [vmem:[#allocation8 + $0x18] sm:$0xff]   ;;  %v1650_v32 = vld [vmem:[#allocation3 + $0xe0] ss:$8 sps:$4 sm:$0xff]  }
  0x42   :  { %1388 = vmatprep.subr.bf16.mxu0 %v1596_v6  ;;  %1569 = vmatprep.subr.bf16.mxu1 %v1596_v6  ;;  %v1615_v31 = vld [vmem:[#allocation3 + $0x34] ss:$8 sps:$4 sm:$0xff]   ;;  %v1617_v34 = vld [vmem:[#allocation3 + $0x30] ss:$8 sps:$4 sm:$0xff]   ;;  %v1618_v35 = vld [vmem:[#allocation3 + $0x44] ss:$8 sps:$4 sm:$0xff]  }
  0x43   :  { %v1651_v33 = vld [vmem:[#allocation3 + $0xf4] ss:$8 sps:$4 sm:$0xff]   ;;  %v1653_v36 = vld [vmem:[#allocation3 + $0xf0] ss:$8 sps:$4 sm:$0xff]   ;;  %v1620_v37 = vld [vmem:[#allocation3 + $0x40] ss:$8 sps:$4 sm:$0xff]  }
  0x44   :  { %v1621_v38 = vld [vmem:[#allocation3 + $0x54] ss:$8 sps:$4 sm:$0xff]   ;;  %v1623_v39 = vld [vmem:[#allocation3 + $0x50] ss:$8 sps:$4 sm:$0xff]   ;;  %v1624_v40 = vld [vmem:[#allocation3 + $0x64] ss:$8 sps:$4 sm:$0xff]  }
  0x45   :  { %1389 = vmatpush3.bf16.msra.mxu0 %v1597_v7  ;;  %1577 = vmatpush3.bf16.msra.mxu1 %v1597_v7  ;;  %v1626_v41 = vld [vmem:[#allocation3 + $0x60] ss:$8 sps:$4 sm:$0xff]   ;;  %v1627_v42 = vld [vmem:[#allocation3 + $0x74] ss:$8 sps:$4 sm:$0xff]   ;;  %v1629_v43 = vld [vmem:[#allocation3 + $0x70] ss:$8 sps:$4 sm:$0xff]  }
  0x46   :  { %1390 = vmatprep.subr.bf16.mxu0 %v1598_v8  ;;  %1570 = vmatprep.subr.bf16.mxu1 %v1598_v8  ;;  %v1630_v44 = vld [vmem:[#allocation3 + $0x84] ss:$8 sps:$4 sm:$0xff]   ;;  %v1632_v45 = vld [vmem:[#allocation3 + $0x80] ss:$8 sps:$4 sm:$0xff]   ;;  %v1633_v46 = vld [vmem:[#allocation3 + $0x94] ss:$8 sps:$4 sm:$0xff]  }
  0x47   :  { %v1635_v47 = vld [vmem:[#allocation3 + $0x90] ss:$8 sps:$4 sm:$0xff]   ;;  %v1639_v48 = vld [vmem:[#allocation3 + $0xa4] ss:$8 sps:$4 sm:$0xff]   ;;  %v1641_v49 = vld [vmem:[#allocation3 + $0xa0] ss:$8 sps:$4 sm:$0xff]  }
  0x48   :  { %v1645_v50 = vld [vmem:[#allocation3 + $0xb4] ss:$8 sps:$4 sm:$0xff]   ;;  %v1658_v51 = vld [vmem:[#allocation8 + $0x20] sm:$0xff]   ;;  %v1647_v52 = vld [vmem:[#allocation3 + $0xb0] ss:$8 sps:$4 sm:$0xff]  }
  0x49   :  { %1391 = vmatpush3.bf16.msra.mxu0 %v1599_v9  ;;  %1578 = vmatpush3.bf16.msra.mxu1 %v1599_v9  ;;  %v1659_v53 = vld [vmem:[#allocation8 + $0x28] sm:$0xff]   ;;  %v1660_v54 = vld [vmem:[#allocation8 + $0x30] sm:$0xff]   ;;  %v1661_v55 = vld [vmem:[#allocation8 + $0x38] sm:$0xff]  }
  0x4a   :  { %1392 = vmatprep.subr.bf16.mxu0 %v1600_v10  ;;  %1571 = vmatprep.subr.bf16.mxu1 %v1600_v10 }
  0x4d   :  { %1393 = vmatpush3.bf16.msra.mxu0 %v1601_v12  ;;  %1579 = vmatpush3.bf16.msra.mxu1 %v1601_v12 }
  0x4e   :  { %1394 = vmatprep.subr.bf16.mxu0 %v1602_v13  ;;  %1572 = vmatprep.subr.bf16.mxu1 %v1602_v13 }
  0x51   :  { %1395 = vmatpush3.bf16.msra.mxu0 %v1603_v14  ;;  %1580 = vmatpush3.bf16.msra.mxu1 %v1603_v14 }
  0x52   :  { %1396 = vmatprep.subr.bf16.mxu0 %v1604_v15  ;;  %1573 = vmatprep.subr.bf16.mxu1 %v1604_v15 }
  0x55   :  { %1397 = vmatpush3.bf16.msra.mxu0 %v1605_v16  ;;  %1581 = vmatpush3.bf16.msra.mxu1 %v1605_v16 }
  0x56   :  { %1518 = vmatprep.subr.bf16.mxu1 %v1654_v25 }
  0x58   :  { %481 = vmatmul.mubr.bf16.vlgmr.msra.gmra.mrb[0].mxu0 %v1606_v17  ;;  %577 = vmatmul.mubr.bf16.vlgmr.msra.gmra.mrb[0].mxu1 %v1636_v20 }
  0x59   :  { %488 = vmatprep.mubr.bf16.mxu0 %v1609_v19  ;;  %584 = vmatprep.mubr.bf16.mxu1 %v1642_v21 }
  0x5a   :  { %1519 = vmatpush3.bf16.msra.mxu1 %v1654_v25 }
  0x5b   :  { %1520 = vmatprep.subr.bf16.mxu1 %v1655_v26 }
  0x5e   :  { %1521 = vmatpush3.bf16.msra.mxu1 %v1655_v26 }
  0x5f   :  { %1522 = vmatprep.subr.bf16.mxu1 %v1656_v28 }
  0x60   :  { %489 = vmatmul.mubr.bf16.gmra.mrb[4].mxu0 %v1611_v22  ;;  %585 = vmatmul.mubr.bf16.gmra.mrb[4].mxu1 %v1644_v24 }
  0x61   :  { %496 = vmatprep.mubr.bf16.mxu0 %v1612_v23  ;;  %592 = vmatprep.mubr.bf16.mxu1 %v1648_v27 }
  0x62   :  { %1523 = vmatpush3.bf16.msra.mxu1 %v1656_v28 }
  0x63   :  { %1524 = vmatprep.subr.bf16.mxu1 %v1657_v30 }
  0x66   :  { %1525 = vmatpush3.bf16.msra.mxu1 %v1657_v30 }
  0x67   :  { %1526 = vmatprep.subr.bf16.mxu1 %v1658_v51 }
  0x68   :  { %497 = vmatmul.mubr.bf16.gmra.mrb[8].mxu0 %v1614_v29  ;;  %593 = vmatmul.mubr.bf16.gmra.mrb[8].mxu1 %v1650_v32 }
  0x69   :  { %504 = vmatprep.mubr.bf16.mxu0 %v1615_v31  ;;  %600 = vmatprep.mubr.bf16.mxu1 %v1651_v33 }
  0x6a   :  { %1527 = vmatpush3.bf16.msra.mxu1 %v1658_v51 }
  0x6b   :  { %1528 = vmatprep.subr.bf16.mxu1 %v1659_v53 }
  0x6e   :  { %1529 = vmatpush3.bf16.msra.mxu1 %v1659_v53 }
  0x6f   :  { %1530 = vmatprep.subr.bf16.mxu1 %v1660_v54 }
  0x70   :  { %505 = vmatmul.mubr.bf16.gmra.mrb[12].mxu0 %v1617_v34  ;;  %601 = vmatmul.mubr.bf16.gmra.mrb[12].mxu1 %v1653_v36 }
  0x71   :  { %512 = vmatprep.mubr.bf16.mxu0 %v1618_v35 }
  0x72   :  { %1531 = vmatpush3.bf16.msra.mxu1 %v1660_v54 }
  0x73   :  { %1532 = vmatprep.subr.bf16.mxu1 %v1661_v55 }
  0x76   :  { %1533 = vmatpush3.bf16.msra.mxu1 %v1661_v55 }
  0x78   :  { %513 = vmatmul.mubr.bf16.gmra.mrb[16].mxu0 %v1620_v37 }
  0x79   :  { %520 = vmatprep.mubr.bf16.mxu0 %v1621_v38 }
  0x80   :  { %521 = vmatmul.mubr.bf16.gmra.mrb[20].mxu0 %v1623_v39 }
  0x81   :  { %528 = vmatprep.mubr.bf16.mxu0 %v1624_v40 }
  0x88   :  { %529 = vmatmul.mubr.bf16.gmra.mrb[24].mxu0 %v1626_v41 }
  0x89   :  { %536 = vmatprep.mubr.bf16.mxu0 %v1627_v42 }
  0x90   :  { %537 = vmatmul.mubr.bf16.gmra.mrb[28].mxu0 %v1629_v43 }
  0x91   :  { %544 = vmatprep.mubr.bf16.mxu0 %v1630_v44 }
  0x98   :  { %545 = vmatmul.mubr.bf16.gmra.mrb[32].mxu0 %v1632_v45 }
  0x99   :  { %552 = vmatprep.mubr.bf16.mxu0 %v1633_v46 }
  0xa0   :  { %553 = vmatmul.mubr.bf16.gmra.mrb[36].mxu0 %v1635_v47 }
  0xa1   :  { %560 = vmatprep.mubr.bf16.mxu0 %v1639_v48 }
  0xa8   :  { %561 = vmatmul.mubr.bf16.gmra.mrb[40].mxu0 %v1641_v49 }
  0xa9   :  { %568 = vmatprep.mubr.bf16.mxu0 %v1645_v50 }
  0xb0   :  { %569 = vmatmul.mubr.bf16.gmra.mrb[44].mxu0 %v1647_v52 }
 0x12b   :  { %v1398_v56 = vpop.f32.mrb[0].mxu0  ;;  %v1470_v58 = vpop.f32.mrb[0].mxu1 }
 0x12c   :  { %v1399_v57 = vpop.f32.mrb[1].mxu0  ;;  %v1471_v61 = vpop.f32.mrb[1].mxu1 }
 0x12d   :  { %v1400_v59 = vadd.f32 %v1399_v57, %v1398_v56  ;;  %v1401_v60 = vpop.f32.mrb[2].mxu0  ;;  %v1831_v63 = vadd.f32 %v1471_v61, %v1470_v58  ;;  %v1473_v0 = vpop.f32.mrb[2].mxu1 }
 0x12e   :  { %v1402_v62 = vpop.f32.mrb[3].mxu0  ;;  %v1474_v2 = vpop.f32.mrb[3].mxu1 }
 0x12f   :  { %v1403_v1 = vadd.f32 %v1402_v62, %v1401_v60  ;;  %v1833_v3 = vadd.f32 %v1474_v2, %v1473_v0 }
 0x131   :  { %v708_v4 = vpack.c.bf16 %v1403_v1, %v1400_v59  ;;  %v720_v5 = vpack.c.bf16 %v1833_v3, %v1831_v63 }
 0x133   :  { %v1404_v6 = vpop.f32.mrb[4].mxu0  ;;  %1534 = vmatprep.mubr.bf16.mxu1 %v708_v4  ;;  %v1476_v8 = vpop.f32.mrb[4].mxu1 }
 0x134   :  { %v1405_v7 = vpop.f32.mrb[5].mxu0  ;;  %v1477_v11 = vpop.f32.mrb[5].mxu1 }
 0x135   :  { %v1406_v9 = vadd.f32 %v1405_v7, %v1404_v6  ;;  %v1407_v10 = vpop.f32.mrb[6].mxu0  ;;  %v1837_v13 = vadd.f32 %v1477_v11, %v1476_v8  ;;  %v1479_v14 = vpop.f32.mrb[6].mxu1 }
 0x136   :  { %v1408_v12 = vpop.f32.mrb[7].mxu0  ;;  %v1480_v16 = vpop.f32.mrb[7].mxu1 }
 0x137   :  { %v1409_v15 = vadd.f32 %v1408_v12, %v1407_v10  ;;  %v1839_v17 = vadd.f32 %v1480_v16, %v1479_v14 }
 0x139   :  { %v709_v18 = vpack.c.bf16 %v1409_v15, %v1406_v9  ;;  %v721_v19 = vpack.c.bf16 %v1839_v17, %v1837_v13 }
 0x13b   :  { %v1410_v20 = vpop.f32.mrb[8].mxu0  ;;  %1535 = vmatmul.mubr.bf16.vlgmr.msra.gmra.mrb[16].mxu1 %v709_v18  ;;  %v1482_v22 = vpop.f32.mrb[8].mxu1 }
 0x13c   :  { %v1411_v21 = vpop.f32.mrb[9].mxu0  ;;  %v1483_v25 = vpop.f32.mrb[9].mxu1 }
 0x13d   :  { %v1412_v23 = vadd.f32 %v1411_v21, %v1410_v20  ;;  %v1413_v24 = vpop.f32.mrb[10].mxu0  ;;  %v1843_v27 = vadd.f32 %v1483_v25, %v1482_v22  ;;  %v1485_v28 = vpop.f32.mrb[10].mxu1 }
 0x13e   :  { %v1414_v26 = vpop.f32.mrb[11].mxu0  ;;  %v1486_v30 = vpop.f32.mrb[11].mxu1 }
 0x13f   :  { %v1415_v29 = vadd.f32 %v1414_v26, %v1413_v24  ;;  %v1845_v31 = vadd.f32 %v1486_v30, %v1485_v28 }
 0x141   :  { %v710_v32 = vpack.c.bf16 %v1415_v29, %v1412_v23  ;;  %v722_v33 = vpack.c.bf16 %v1845_v31, %v1843_v27 }
 0x143   :  { %v1416_v34 = vpop.f32.mrb[12].mxu0  ;;  %1538 = vmatprep.mubr.bf16.mxu1 %v710_v32  ;;  %v1488_v36 = vpop.f32.mrb[12].mxu1 }
 0x144   :  { %v1417_v35 = vpop.f32.mrb[13].mxu0  ;;  %v1489_v39 = vpop.f32.mrb[13].mxu1 }
 0x145   :  { %v1418_v37 = vadd.f32 %v1417_v35, %v1416_v34  ;;  %v1419_v38 = vpop.f32.mrb[14].mxu0  ;;  %v1849_v41 = vadd.f32 %v1489_v39, %v1488_v36  ;;  %v1491_v42 = vpop.f32.mrb[14].mxu1 }
 0x146   :  { %v1420_v40 = vpop.f32.mrb[15].mxu0  ;;  %v1492_v44 = vpop.f32.mrb[15].mxu1 }
 0x147   :  { %v1421_v43 = vadd.f32 %v1420_v40, %v1419_v38  ;;  %v1851_v45 = vadd.f32 %v1492_v44, %v1491_v42 }
 0x149   :  { %v711_v46 = vpack.c.bf16 %v1421_v43, %v1418_v37  ;;  %v723_v47 = vpack.c.bf16 %v1851_v45, %v1849_v41 }
 0x14b   :  { %v1422_v48 = vpop.f32.mrb[16].mxu0  ;;  %1539 = vmatmul.mubr.bf16.gmra.mrb[20].mxu1 %v711_v46 }
 0x14c   :  { %v1423_v49 = vpop.f32.mrb[17].mxu0 }
 0x14d   :  { %v1424_v50 = vadd.f32 %v1423_v49, %v1422_v48  ;;  %v1425_v51 = vpop.f32.mrb[18].mxu0 }
 0x14e   :  { %v1426_v52 = vpop.f32.mrb[19].mxu0 }
 0x14f   :  { %v1427_v53 = vadd.f32 %v1426_v52, %v1425_v51  ;;  %v1870_v52 = vld [vmem:[%s1922_s3] ss:$0 sm:$0xff]  ;;  %s1763_s3 = smov [#allocation9]  }
 0x150   :  { %s1153_s30 = sshll.u32 %s1763_s3, 4  ;;  %s1154_s30 = int_to_ptr.vmem [resolvable:$true] %s1153_s30 }
 0x151   :  { %v712_v54 = vpack.c.bf16 %v1427_v53, %v1424_v50  ;;  %s1728_s5 = scalar_lea.vmem %s1154_s30, 2048  ;;  %p1733_p11 = scmp.lt.s32.totalorder %s1154_s30, %s1154_s30 }
 0x152   :  { %p1729_p10 = scmp.ne.s32.totalorder %s1154_s30, %s1728_s5  ;;  %p1734_p12 = scmp.lt.s32.totalorder %s1728_s5, %s1728_s5 }
 0x153   :  { %v1428_v55 = vpop.f32.mrb[20].mxu0  ;;  %1542 = vmatprep.mubr.bf16.mxu1 %v712_v54 }
 0x154   :  { %v1429_v56 = vpop.f32.mrb[21].mxu0  ;;  %p1735_p13 = por %p1734_p12, %p1733_p11 }
 0x155   :  { %v1430_v57 = vadd.f32 %v1429_v56, %v1428_v55  ;;  %v1431_v58 = vpop.f32.mrb[22].mxu0 }
 0x156   :  { %v1432_v59 = vpop.f32.mrb[23].mxu0  ;;  %p1736_p0 = pnand %p1735_p13, %p1729_p10 }
 0x157   :  { %v1433_v60 = vadd.f32 %v1432_v59, %v1431_v58 }
 0x159   :  { %v713_v61 = vpack.c.bf16 %v1433_v60, %v1430_v57 }
 0x15b   :  { %v1434_v62 = vpop.f32.mrb[24].mxu0  ;;  %1543 = vmatmul.mubr.bf16.gmra.mrb[24].mxu1 %v713_v61 }
 0x15c   :  { %v1435_v0 = vpop.f32.mrb[25].mxu0 }
 0x15d   :  { %v1436_v1 = vadd.f32 %v1435_v0, %v1434_v62  ;;  %v1437_v2 = vpop.f32.mrb[26].mxu0 }
 0x15e   :  { %v1438_v4 = vpop.f32.mrb[27].mxu0 }
 0x15f   :  { %v1439_v6 = vadd.f32 %v1438_v4, %v1437_v2 }
 0x161   :  { %v714_v7 = vpack.c.bf16 %v1439_v6, %v1436_v1 }
 0x163   :  { %v1440_v8 = vpop.f32.mrb[28].mxu0  ;;  %1546 = vmatprep.mubr.bf16.mxu1 %v714_v7 }
 0x164   :  { %v1441_v9 = vpop.f32.mrb[29].mxu0 }
 0x165   :  { %v1442_v10 = vadd.f32 %v1441_v9, %v1440_v8  ;;  %v1443_v11 = vpop.f32.mrb[30].mxu0 }
 0x166   :  { %v1444_v12 = vpop.f32.mrb[31].mxu0 }
 0x167   :  { %v1445_v14 = vadd.f32 %v1444_v12, %v1443_v11 }
 0x169   :  { %v715_v15 = vpack.c.bf16 %v1445_v14, %v1442_v10 }
 0x16b   :  { %v1446_v16 = vpop.f32.mrb[32].mxu0  ;;  %1547 = vmatmul.mubr.bf16.gmra.mrb[28].mxu1 %v715_v15 }
 0x16c   :  { %v1447_v18 = vpop.f32.mrb[33].mxu0 }
 0x16d   :  { %v1448_v20 = vadd.f32 %v1447_v18, %v1446_v16  ;;  %v1449_v21 = vpop.f32.mrb[34].mxu0 }
 0x16e   :  { %v1450_v22 = vpop.f32.mrb[35].mxu0 }
 0x16f   :  { %v1451_v23 = vadd.f32 %v1450_v22, %v1449_v21 }
 0x171   :  { %v716_v24 = vpack.c.bf16 %v1451_v23, %v1448_v20 }
 0x173   :  { %v1452_v25 = vpop.f32.mrb[36].mxu0  ;;  %1550 = vmatprep.mubr.bf16.mxu1 %v716_v24 }
 0x174   :  { %v1453_v26 = vpop.f32.mrb[37].mxu0 }
 0x175   :  { %v1454_v28 = vadd.f32 %v1453_v26, %v1452_v25  ;;  %v1455_v29 = vpop.f32.mrb[38].mxu0 }
 0x176   :  { %v1456_v30 = vpop.f32.mrb[39].mxu0 }
 0x177   :  { %v1457_v32 = vadd.f32 %v1456_v30, %v1455_v29 }
 0x179   :  { %v717_v34 = vpack.c.bf16 %v1457_v32, %v1454_v28 }
 0x17b   :  { %v1458_v35 = vpop.f32.mrb[40].mxu0  ;;  %1551 = vmatmul.mubr.bf16.gmra.mrb[32].mxu1 %v717_v34 }
 0x17c   :  { %v1459_v36 = vpop.f32.mrb[41].mxu0 }
 0x17d   :  { %v1460_v37 = vadd.f32 %v1459_v36, %v1458_v35  ;;  %v1461_v38 = vpop.f32.mrb[42].mxu0 }
 0x17e   :  { %v1462_v39 = vpop.f32.mrb[43].mxu0 }
 0x17f   :  { %v1463_v40 = vadd.f32 %v1462_v39, %v1461_v38 }
 0x181   :  { %v718_v42 = vpack.c.bf16 %v1463_v40, %v1460_v37 }
 0x183   :  { %v1464_v43 = vpop.f32.mrb[44].mxu0  ;;  %1554 = vmatprep.mubr.bf16.mxu1 %v718_v42 }
 0x184   :  { %v1465_v44 = vpop.f32.mrb[45].mxu0 }
 0x185   :  { %v1466_v46 = vadd.f32 %v1465_v44, %v1464_v43  ;;  %v1467_v48 = vpop.f32.mrb[46].mxu0 }
 0x186   :  { %v1468_v49 = vpop.f32.mrb[47].mxu0 }
 0x187   :  { %v1469_v50 = vadd.f32 %v1468_v49, %v1467_v48 }
 0x189   :  { %v719_v51 = vpack.c.bf16 %v1469_v50, %v1466_v46 }
 0x18b   :  { %1555 = vmatmul.mubr.bf16.gmra.mrb[36].mxu1 %v719_v51 }
 0x18c   :  { %1558 = vmatprep.mubr.bf16.mxu1 %v720_v5 }
 0x193   :  { %1559 = vmatmul.mubr.bf16.gmra.mrb[40].mxu1 %v721_v19 }
 0x194   :  { %1562 = vmatprep.mubr.bf16.mxu1 %v722_v33 }
 0x19b   :  { %1563 = vmatmul.mubr.bf16.gmra.mrb[44].mxu1 %v723_v47 }
 0x20e   :  { %v1536_v53 = vpop.f32.mrb[16].mxu1 }
 0x20f   :  { %v838_v63 = vadd.f32 %v1536_v53, %v1870_v52  ;;  %v829_v3 = vpop.f32.mrb[17].mxu1 }
 0x210   :  { %v830_v5 = vadd.f32 %v1870_v52, %v829_v3  ;;  %v1537_v13 = vpop.f32.mrb[18].mxu1 }
 0x211   :  { %v841_v17 = vadd.f32 %v1537_v13, %v1870_v52  ;;  %v832_v19 = vpop.f32.mrb[19].mxu1  ;;  %v958_v31 = vmax.f32 %v838_v63, 0.0 }
 0x212   :  { %v833_v27 = vadd.f32 %v1870_v52, %v832_v19  ;;  %v956_v41 = vmax.f32 %v830_v5, 0.0 }
 0x213   :  { %v959_v33 = vmax.f32 %v841_v17, 0.0 }
 0x214   :  { %v957_v45 = vmax.f32 %v833_v27, 0.0 }
 0x215   :  { %v1295_v47 = vpack.c.bf16 %v959_v33, %v958_v31 }
 0x216   :  { %v1290_v54 = vpack.c.bf16 %v957_v45, %v956_v41 }
 0x217   :  { %1367 = vst [vmem:[#allocation9 + $0x8] sm:$0xff] %v1295_v47  }
 0x218   :  { %1291 = vst [vmem:[#allocation9] sm:$0xff] %v1290_v54  }
 0x21e   :  { %v1540_v55 = vpop.f32.mrb[20].mxu1 }
 0x21f   :  { %v854_v56 = vadd.f32 %v1540_v55, %v1870_v52  ;;  %v845_v57 = vpop.f32.mrb[21].mxu1 }
 0x220   :  { %v846_v58 = vadd.f32 %v1870_v52, %v845_v57  ;;  %v1541_v59 = vpop.f32.mrb[22].mxu1 }
 0x221   :  { %v857_v60 = vadd.f32 %v1541_v59, %v1870_v52  ;;  %v848_v61 = vpop.f32.mrb[23].mxu1  ;;  %v962_v0 = vmax.f32 %v854_v56, 0.0 }
 0x222   :  { %v849_v62 = vadd.f32 %v1870_v52, %v848_v61  ;;  %v960_v2 = vmax.f32 %v846_v58, 0.0 }
 0x223   :  { %v963_v1 = vmax.f32 %v857_v60, 0.0 }
 0x224   :  { %v961_v4 = vmax.f32 %v849_v62, 0.0 }
 0x225   :  { %v1305_v6 = vpack.c.bf16 %v963_v1, %v962_v0 }
 0x226   :  { %v1300_v7 = vpack.c.bf16 %v961_v4, %v960_v2 }
 0x227   :  { %1369 = vst [vmem:[#allocation9 + $0x18] sm:$0xff] %v1305_v6  }
 0x228   :  { %1368 = vst [vmem:[#allocation9 + $0x10] sm:$0xff] %v1300_v7  }
 0x22e   :  { %v1544_v8 = vpop.f32.mrb[24].mxu1 }
 0x22f   :  { %v870_v9 = vadd.f32 %v1544_v8, %v1870_v52  ;;  %v861_v10 = vpop.f32.mrb[25].mxu1 }
 0x230   :  { %v862_v11 = vadd.f32 %v1870_v52, %v861_v10  ;;  %v1545_v12 = vpop.f32.mrb[26].mxu1 }
 0x231   :  { %v873_v14 = vadd.f32 %v1545_v12, %v1870_v52  ;;  %v864_v15 = vpop.f32.mrb[27].mxu1  ;;  %v966_v18 = vmax.f32 %v870_v9, 0.0 }
 0x232   :  { %v865_v16 = vadd.f32 %v1870_v52, %v864_v15  ;;  %v964_v21 = vmax.f32 %v862_v11, 0.0 }
 0x233   :  { %v967_v20 = vmax.f32 %v873_v14, 0.0 }
 0x234   :  { %v965_v22 = vmax.f32 %v865_v16, 0.0 }
 0x235   :  { %v1315_v23 = vpack.c.bf16 %v967_v20, %v966_v18 }
 0x236   :  { %v1310_v24 = vpack.c.bf16 %v965_v22, %v964_v21 }
 0x237   :  { %1371 = vst [vmem:[#allocation9 + $0x28] sm:$0xff] %v1315_v23  }
 0x238   :  { %1370 = vst [vmem:[#allocation9 + $0x20] sm:$0xff] %v1310_v24  }
 0x23e   :  { %v1548_v25 = vpop.f32.mrb[28].mxu1 }
 0x23f   :  { %v886_v26 = vadd.f32 %v1548_v25, %v1870_v52  ;;  %v877_v28 = vpop.f32.mrb[29].mxu1 }
 0x240   :  { %v878_v29 = vadd.f32 %v1870_v52, %v877_v28  ;;  %v1549_v30 = vpop.f32.mrb[30].mxu1 }
 0x241   :  { %v889_v32 = vadd.f32 %v1549_v30, %v1870_v52  ;;  %v880_v34 = vpop.f32.mrb[31].mxu1  ;;  %v970_v36 = vmax.f32 %v886_v26, 0.0 }
 0x242   :  { %v881_v35 = vadd.f32 %v1870_v52, %v880_v34  ;;  %v968_v38 = vmax.f32 %v878_v29, 0.0 }
 0x243   :  { %v971_v37 = vmax.f32 %v889_v32, 0.0 }
 0x244   :  { %v969_v39 = vmax.f32 %v881_v35, 0.0 }
 0x245   :  { %v1325_v40 = vpack.c.bf16 %v971_v37, %v970_v36 }
 0x246   :  { %v1320_v42 = vpack.c.bf16 %v969_v39, %v968_v38 }
 0x247   :  { %1373 = vst [vmem:[#allocation9 + $0x38] sm:$0xff] %v1325_v40  }
 0x248   :  { %1372 = vst [vmem:[#allocation9 + $0x30] sm:$0xff] %v1320_v42  }
 0x24e   :  { %v1552_v43 = vpop.f32.mrb[32].mxu1 }
 0x24f   :  { %v902_v44 = vadd.f32 %v1552_v43, %v1870_v52  ;;  %v893_v46 = vpop.f32.mrb[33].mxu1 }
 0x250   :  { %v894_v48 = vadd.f32 %v1870_v52, %v893_v46  ;;  %v1553_v49 = vpop.f32.mrb[34].mxu1 }
 0x251   :  { %v905_v50 = vadd.f32 %v1553_v49, %v1870_v52  ;;  %v896_v51 = vpop.f32.mrb[35].mxu1  ;;  %v974_v63 = vmax.f32 %v902_v44, 0.0 }
 0x252   :  { %v897_v53 = vadd.f32 %v1870_v52, %v896_v51  ;;  %v972_v5 = vmax.f32 %v894_v48, 0.0 }
 0x253   :  { %v975_v3 = vmax.f32 %v905_v50, 0.0 }
 0x254   :  { %v973_v13 = vmax.f32 %v897_v53, 0.0 }
 0x255   :  { %v1335_v17 = vpack.c.bf16 %v975_v3, %v974_v63 }
 0x256   :  { %v1330_v19 = vpack.c.bf16 %v973_v13, %v972_v5 }
 0x257   :  { %1375 = vst [vmem:[#allocation9 + $0x48] sm:$0xff] %v1335_v17  }
 0x258   :  { %1374 = vst [vmem:[#allocation9 + $0x40] sm:$0xff] %v1330_v19  }
 0x25e   :  { %v1556_v27 = vpop.f32.mrb[36].mxu1 }
 0x25f   :  { %v918_v31 = vadd.f32 %v1556_v27, %v1870_v52  ;;  %v909_v33 = vpop.f32.mrb[37].mxu1 }
 0x260   :  { %v910_v41 = vadd.f32 %v1870_v52, %v909_v33  ;;  %v1557_v45 = vpop.f32.mrb[38].mxu1 }
 0x261   :  { %v921_v47 = vadd.f32 %v1557_v45, %v1870_v52  ;;  %v912_v54 = vpop.f32.mrb[39].mxu1  ;;  %v978_v56 = vmax.f32 %v918_v31, 0.0 }
 0x262   :  { %v913_v55 = vadd.f32 %v1870_v52, %v912_v54  ;;  %v976_v58 = vmax.f32 %v910_v41, 0.0 }
 0x263   :  { %v979_v57 = vmax.f32 %v921_v47, 0.0 }
 0x264   :  { %v977_v59 = vmax.f32 %v913_v55, 0.0 }
 0x265   :  { %v1345_v60 = vpack.c.bf16 %v979_v57, %v978_v56 }
 0x266   :  { %v1340_v61 = vpack.c.bf16 %v977_v59, %v976_v58  ;;  %v1560_v62 = vpop.f32.mrb[40].mxu1 }
 0x267   :  { %1377 = vst [vmem:[#allocation9 + $0x58] sm:$0xff] %v1345_v60   ;;  %v934_v0 = vadd.f32 %v1560_v62, %v1870_v52  ;;  %v925_v1 = vpop.f32.mrb[41].mxu1 }
 0x268   :  { %1376 = vst [vmem:[#allocation9 + $0x50] sm:$0xff] %v1340_v61   ;;  %v926_v2 = vadd.f32 %v1870_v52, %v925_v1  ;;  %v1561_v4 = vpop.f32.mrb[42].mxu1 }
 0x269   :  { %v937_v6 = vadd.f32 %v1561_v4, %v1870_v52  ;;  %v928_v7 = vpop.f32.mrb[43].mxu1  ;;  %v982_v9 = vmax.f32 %v934_v0, 0.0 }
 0x26a   :  { %v929_v8 = vadd.f32 %v1870_v52, %v928_v7  ;;  %v980_v11 = vmax.f32 %v926_v2, 0.0 }
 0x26b   :  { %v983_v10 = vmax.f32 %v937_v6, 0.0 }
 0x26c   :  { %v981_v12 = vmax.f32 %v929_v8, 0.0 }
 0x26d   :  { %v1355_v14 = vpack.c.bf16 %v983_v10, %v982_v9 }
 0x26e   :  { %v1350_v15 = vpack.c.bf16 %v981_v12, %v980_v11  ;;  %v1564_v16 = vpop.f32.mrb[44].mxu1 }
 0x26f   :  { %1379 = vst [vmem:[#allocation9 + $0x68] sm:$0xff] %v1355_v14   ;;  %v950_v18 = vadd.f32 %v1564_v16, %v1870_v52  ;;  %v941_v20 = vpop.f32.mrb[45].mxu1 }
 0x270   :  { %1378 = vst [vmem:[#allocation9 + $0x60] sm:$0xff] %v1350_v15   ;;  %v942_v21 = vadd.f32 %v1870_v52, %v941_v20  ;;  %v1565_v22 = vpop.f32.mrb[46].mxu1 }
 0x271   :  { %v953_v23 = vadd.f32 %v1565_v22, %v1870_v52  ;;  %v944_v24 = vpop.f32.mrb[47].mxu1  ;;  %v986_v26 = vmax.f32 %v950_v18, 0.0 }
 0x272   :  { %v945_v25 = vadd.f32 %v1870_v52, %v944_v24  ;;  %v984_v29 = vmax.f32 %v942_v21, 0.0 }
 0x273   :  { %v987_v28 = vmax.f32 %v953_v23, 0.0 }
 0x274   :  { %v985_v30 = vmax.f32 %v945_v25, 0.0 }
 0x275   :  { %v1365_v32 = vpack.c.bf16 %v987_v28, %v986_v26 }
 0x276   :  { %v1360_v34 = vpack.c.bf16 %v985_v30, %v984_v29 }
 0x277   :  { %1381 = vst [vmem:[#allocation9 + $0x78] sm:$0xff] %v1365_v32  }
 0x278   :  { %1380 = vst [vmem:[#allocation9 + $0x70] sm:$0xff] %v1360_v34  }
 0x279   :  { %1739 = shalt.err (!%p1736_p0)
}
 0x27a   :  { %s1740_s8 = scalar_lea.hbm %s1923_s4, 2048 }
 0x27b   :  { %p1741_p1 = scmp.ne.s32.totalorder %s1923_s4, %s1740_s8  ;;  %p1744_p2 = scmp.lt.u32.totalorder %s1740_s8, %s1923_s4 }
 0x27d   :  { %p1746_p3 = pnand %p1744_p2, %p1741_p1 }
 0x27f   :  { %1749 = shalt.err (!%p1746_p3)
}
 0x280   :  { %1159 = dma.vmem_to_hbm [thread:$0]  %s1154_s30, 2048, %s1923_s4, [#allocation5], %s1757_s25, %s1757_s25, %s1758_s26  }
 0x281   :  { %1754 = dma.done.wait [#allocation5], 2048  }
 0x282   :  { %1755 = vsyncadd [#allocation5], 4294965248 }
 0x283   :  { %1163 = vsyncpa [#allocation4], 1 }
 0x284   :  { %1164 = vsyncpa [#allocation7], 1 }
 0x285   :  { %1165 = vsyncpa [#allocation5], 1 }

</bundles_post_ra>
